<compile_context>
chip_gen: v6e
topology: v6e:2x2x1
jax: 0.10.0
libtpu: 0.0.40
codegen_flags: <defaults>
</compile_context>

<pallas_src>
import functools

import jax
import jax.numpy as jnp
from jax import lax
from jax.experimental import pallas as pl
from jax.experimental.pallas import tpu as pltpu


def _softplus(x):
    # numerically-stable, single-exp softplus: max(x,0) + log1p(exp(-|x|))
    return jnp.maximum(x, 0.0) + jnp.log1p(jnp.exp(-jnp.abs(x)))


def _round_up(x, m):
    return ((x + m - 1) // m) * m


def _choose_batch_tile(B):
    """Batch tile: whole batch if tiny; otherwise >=2 grid steps (v7x megacore)
    with tiles capped at 512 rows (multiple of 8 sublanes)."""
    if B <= 8:
        return B
    half = -(-B // 2)                    # ceil(B/2) -> at least 2 grid steps
    return min(512, _round_up(half, 8))


def actor_critic_kernel(state_ref, w1_ref, b1_ref, w2a_ref, b2a_ref,
                        w2c_ref, b2c_ref, w3a_ref, w3c_ref, b3_ref, out_ref,
                        *, action_dim, hidden_dim, compute_dtype):
    c = compute_dtype
    s = state_ref[...].astype(c)

    # fused layer 1: [actor_fc1 | critic_fc1] in one MXU pass -> (TB, 2H)
    h1 = jnp.dot(s, w1_ref[...].astype(c), preferred_element_type=jnp.float32)
    h1 = jnp.maximum(h1 + b1_ref[...], 0.0)

    h1a = h1[:, :hidden_dim].astype(c)
    h1c = h1[:, hidden_dim:].astype(c)

    # layer 2: two (H,H) dots (no zero-padded block-diagonal)
    h2a = jnp.dot(h1a, w2a_ref[...].astype(c), preferred_element_type=jnp.float32)
    h2a = jnp.maximum(h2a + b2a_ref[...], 0.0).astype(c)
    h2c = jnp.dot(h1c, w2c_ref[...].astype(c), preferred_element_type=jnp.float32)
    h2c = jnp.maximum(h2c + b2c_ref[...], 0.0).astype(c)

    # heads: lane-padded weights place [mean | std | value | 0...] directly in
    # their output lanes -> (TB, OUT_PAD) lane-dense slab, no scatter needed.
    h3 = (jnp.dot(h2a, w3a_ref[...].astype(c), preferred_element_type=jnp.float32)
          + jnp.dot(h2c, w3c_ref[...].astype(c), preferred_element_type=jnp.float32)
          + b3_ref[...])

    # per-lane activation: cols [0,A) tanh, [A,2A) softplus+eps, rest identity
    col = lax.broadcasted_iota(jnp.int32, h3.shape, 1)
    mean_part = jnp.tanh(h3)
    std_part = _softplus(h3) + 1e-6
    out = jnp.where(col < action_dim, mean_part,
                    jnp.where(col < 2 * action_dim, std_part, h3))

    out_ref[...] = out.astype(out_ref.dtype)


def fuse_params(params, compute_dtype=jnp.float32):
    """Build fused / lane-padded weights ONCE (hoist out of the per-step path).

    Weights are stored in `compute_dtype` (f32 for exact parity, bf16 for the
    v6e/v7x MXU-native path); biases stay f32.
    """
    S, H = params["actor_fc1_w"].shape
    A = params["actor_mean_w"].shape[1]
    out_pad = max(128, _round_up(2 * A + 1, 128))
    wt = compute_dtype

    # fused layer 1: (S, 2H)
    w1 = jnp.concatenate([params["actor_fc1_w"], params["critic_fc1_w"]], axis=1).astype(wt)
    b1 = jnp.concatenate([params["actor_fc1_b"], params["critic_fc1_b"]], axis=1).astype(jnp.float32)

    # layer 2 kept as two (H, H) matrices (no zero padding)
    w2a = params["actor_fc2_w"].astype(wt)
    b2a = params["actor_fc2_b"].astype(jnp.float32)
    w2c = params["critic_fc2_w"].astype(wt)
    b2c = params["critic_fc2_b"].astype(jnp.float32)

    # heads, zero-padded to a 128-lane-dense output layout:
    #   actor h2 @ w3a -> mean in [0,A), std in [A,2A)
    #   critic h2 @ w3c -> value in [2A]
    w3a = jnp.zeros((H, out_pad), wt)
    w3a = w3a.at[:, :A].set(params["actor_mean_w"].astype(wt))
    w3a = w3a.at[:, A:2 * A].set(params["actor_std_w"].astype(wt))
    w3c = jnp.zeros((H, out_pad), wt)
    w3c = w3c.at[:, 2 * A:2 * A + 1].set(params["critic_value_w"].astype(wt))

    b3 = jnp.zeros((1, out_pad), jnp.float32)
    b3 = b3.at[:, :A].set(params["actor_mean_b"])
    b3 = b3.at[:, A:2 * A].set(params["actor_std_b"])
    b3 = b3.at[:, 2 * A:2 * A + 1].set(params["critic_value_b"])

    fused = dict(w1=w1, b1=b1, w2a=w2a, b2a=b2a, w2c=w2c, b2c=b2c,
                 w3a=w3a, w3c=w3c, b3=b3)
    meta = dict(hidden_dim=H, action_dim=A, out_pad=out_pad)
    return fused, meta


@functools.partial(jax.jit,
                   static_argnames=("action_dim", "hidden_dim", "out_pad",
                                    "compute_dtype"))
def actor_critic_forward(state, fused, *, action_dim, hidden_dim, out_pad,
                         compute_dtype=jnp.float32):
    """state: (B, state_dim) f32; fused: output of fuse_params (already fused).
    Returns (mean, std, value)."""
    B, S = state.shape
    TB = _choose_batch_tile(B)
    grid = (pl.cdiv(B, TB),)

    order = ("w1", "b1", "w2a", "b2a", "w2c", "b2c", "w3a", "w3c", "b3")
    weight_args = [fused[k] for k in order]

    def resident(arr):
        # VMEM-resident across all batch tiles, single-buffered (constant
        # index_map -> no re-DMA, half the weight VMEM vs double-buffering).
        return pl.BlockSpec(arr.shape, lambda i: (0, 0),
                            pipeline_mode=pl.Buffered(1))

    # Explicit VMEM budget (weights single-buffered, state/output double-
    # buffered, plus activation headroom), capped at v7x's 64 MiB physical.
    weight_bytes = sum(a.size * a.dtype.itemsize for a in weight_args)
    stream_bytes = 2 * TB * S * state.dtype.itemsize + 2 * TB * out_pad * 4
    act_bytes = TB * (4 * hidden_dim + 2 * out_pad) * 4
    vmem_limit = int(min(64 * 1024 * 1024,
                         max(32 * 1024 * 1024,
                             2 * (weight_bytes + stream_bytes + act_bytes))))

    packed = pl.pallas_call(
        functools.partial(actor_critic_kernel,
                          action_dim=action_dim, hidden_dim=hidden_dim,
                          compute_dtype=compute_dtype),
        out_shape=jax.ShapeDtypeStruct((B, out_pad), jnp.float32),
        grid=grid,
        in_specs=[pl.BlockSpec((TB, S), lambda i: (i, 0))]    # state, batch-blocked
                 + [resident(a) for a in weight_args],
        out_specs=pl.BlockSpec((TB, out_pad), lambda i: (i, 0)),
        compiler_params=pltpu.CompilerParams(
            dimension_semantics=("parallel",),
            vmem_limit_bytes=vmem_limit),
    )(state, *weight_args)

    A = action_dim
    mean = packed[:, :A]
    std = packed[:, A:2 * A]
    value = packed[:, 2 * A:2 * A + 1]
    return mean, std, value


def init_params(key, state_dim, action_dim, hidden_dim):
    """nn.Linear-style init U(-1/sqrt(fan_in), 1/sqrt(fan_in)).
    Weights stored as (in_features, out_features); biases as (1, out_features)."""
    def linear(k, fan_in, fan_out):
        kw, kb = jax.random.split(k)
        bound = 1.0 / jnp.sqrt(fan_in)
        w = jax.random.uniform(kw, (fan_in, fan_out), jnp.float32, -bound, bound)
        b = jax.random.uniform(kb, (1, fan_out), jnp.float32, -bound, bound)
        return w, b

    keys = jax.random.split(key, 7)
    p = {}
    p["actor_fc1_w"], p["actor_fc1_b"] = linear(keys[0], state_dim, hidden_dim)
    p["actor_fc2_w"], p["actor_fc2_b"] = linear(keys[1], hidden_dim, hidden_dim)
    p["actor_mean_w"], p["actor_mean_b"] = linear(keys[2], hidden_dim, action_dim)
    p["actor_std_w"], p["actor_std_b"] = linear(keys[3], hidden_dim, action_dim)
    p["critic_fc1_w"], p["critic_fc1_b"] = linear(keys[4], state_dim, hidden_dim)
    p["critic_fc2_w"], p["critic_fc2_b"] = linear(keys[5], hidden_dim, hidden_dim)
    p["critic_value_w"], p["critic_value_b"] = linear(keys[6], hidden_dim, 1)
    return p


def _reference(state, p):
    relu = lambda z: jnp.maximum(z, 0.0)
    x = relu(state @ p["actor_fc1_w"] + p["actor_fc1_b"])
    x = relu(x @ p["actor_fc2_w"] + p["actor_fc2_b"])
    mean = jnp.tanh(x @ p["actor_mean_w"] + p["actor_mean_b"])
    std = jax.nn.softplus(x @ p["actor_std_w"] + p["actor_std_b"]) + 1e-6
    v = relu(state @ p["critic_fc1_w"] + p["critic_fc1_b"])
    v = relu(v @ p["critic_fc2_w"] + p["critic_fc2_b"])
    value = v @ p["critic_value_w"] + p["critic_value_b"]
    return mean, std, value


if __name__ == "__main__":
    B, STATE_DIM, ACTION_DIM, HIDDEN_DIM = 2, 16, 4, 32

    key = jax.random.PRNGKey(0)
    k_state, k_params = jax.random.split(key)
    state = jax.random.normal(k_state, (B, STATE_DIM), jnp.float32)
    params = init_params(k_params, STATE_DIM, ACTION_DIM, HIDDEN_DIM)

    # Fuse / pad the weights ONCE (hoisted out of the per-step hot path).
    # For v6e/v7x large-batch use, pass compute_dtype=jnp.bfloat16 here and
    # below (and relax the tolerances); the demo keeps exact f32 parity.
    fused, meta = fuse_params(params, compute_dtype=jnp.float32)

    mean, std, value = actor_critic_forward(state, fused, **meta)
    jax.block_until_ready((mean, std, value))

    # sanity check against a pure-JAX (unfused) reference
    ref_mean, ref_std, ref_value = _reference(state, params)
    assert mean.shape == (B, ACTION_DIM)
    assert std.shape == (B, ACTION_DIM)
    assert value.shape == (B, 1)
    assert jnp.allclose(mean, ref_mean, atol=1e-5)
    assert jnp.allclose(std, ref_std, atol=1e-5)
    assert jnp.allclose(value, ref_value, atol=1e-5)

    print("KERNEL_OK")
</pallas_src>

<mosaic_0001>
module attributes {stable_mosaic.version = 11 : i64} {
  func.func @actor_critic_kernel(%arg0: i32, %arg1: memref<2x16xf32, #tpu.memory_space<vmem>>, %arg2: memref<16x64xf32, #tpu.memory_space<vmem>>, %arg3: memref<1x64xf32, #tpu.memory_space<vmem>>, %arg4: memref<32x32xf32, #tpu.memory_space<vmem>>, %arg5: memref<1x32xf32, #tpu.memory_space<vmem>>, %arg6: memref<32x32xf32, #tpu.memory_space<vmem>>, %arg7: memref<1x32xf32, #tpu.memory_space<vmem>>, %arg8: memref<32x128xf32, #tpu.memory_space<vmem>>, %arg9: memref<32x128xf32, #tpu.memory_space<vmem>>, %arg10: memref<1x128xf32, #tpu.memory_space<vmem>>, %arg11: memref<2x128xf32, #tpu.memory_space<vmem>>) attributes {dimension_semantics = [#tpu.dimension_semantics<parallel>], iteration_bounds = array<i64: 1>, scalar_prefetch = 0 : i64, scratch_operands = 0 : i64, tpu.core_type = #tpu.core_type<tc>, window_params = [{transform_indices = @transform_0, window_bounds = array<i64: 2, 16>}, {pipeline_mode = #tpu.pipeline_mode<synchronous>, transform_indices = @transform_1, window_bounds = array<i64: 16, 64>}, {pipeline_mode = #tpu.pipeline_mode<synchronous>, transform_indices = @transform_2, window_bounds = array<i64: 1, 64>}, {pipeline_mode = #tpu.pipeline_mode<synchronous>, transform_indices = @transform_3, window_bounds = array<i64: 32, 32>}, {pipeline_mode = #tpu.pipeline_mode<synchronous>, transform_indices = @transform_4, window_bounds = array<i64: 1, 32>}, {pipeline_mode = #tpu.pipeline_mode<synchronous>, transform_indices = @transform_5, window_bounds = array<i64: 32, 32>}, {pipeline_mode = #tpu.pipeline_mode<synchronous>, transform_indices = @transform_6, window_bounds = array<i64: 1, 32>}, {pipeline_mode = #tpu.pipeline_mode<synchronous>, transform_indices = @transform_7, window_bounds = array<i64: 32, 128>}, {pipeline_mode = #tpu.pipeline_mode<synchronous>, transform_indices = @transform_8, window_bounds = array<i64: 32, 128>}, {pipeline_mode = #tpu.pipeline_mode<synchronous>, transform_indices = @transform_9, window_bounds = array<i64: 1, 128>}, {transform_indices = @transform_10, window_bounds = array<i64: 2, 128>}]} {
    %c0 = arith.constant 0 : index
    %c0_0 = arith.constant 0 : index
    %0 = vector.load %arg1[%c0, %c0_0] : memref<2x16xf32, #tpu.memory_space<vmem>>, vector<2x16xf32>
    %c0_1 = arith.constant 0 : index
    %c0_2 = arith.constant 0 : index
    %1 = vector.load %arg2[%c0_1, %c0_2] : memref<16x64xf32, #tpu.memory_space<vmem>>, vector<16x64xf32>
    %cst = arith.constant dense<0.000000e+00> : vector<2x64xf32>
    %2 = tpu.matmul %0, %1, %cst {dimension_numbers = #tpu.dot_dimension_numbers<[1], [0], [0], [1], [0, 0, 1, 1], [], []>} : vector<2x16xf32>, vector<16x64xf32>, vector<2x64xf32> -> vector<2x64xf32>
    %c0_3 = arith.constant 0 : index
    %c0_4 = arith.constant 0 : index
    %3 = vector.load %arg3[%c0_3, %c0_4] : memref<1x64xf32, #tpu.memory_space<vmem>>, vector<1x64xf32>
    %4 = vector.broadcast %3 : vector<1x64xf32> to vector<2x64xf32>
    %5 = arith.addf %2, %4 : vector<2x64xf32>
    %cst_5 = arith.constant 0.000000e+00 : f32
    %6 = vector.broadcast %cst_5 : f32 to vector<2x64xf32>
    %7 = arith.maximumf %5, %6 : vector<2x64xf32>
    %8 = vector.extract_strided_slice %7 {offsets = [0, 0], sizes = [2, 32], strides = [1, 1]} : vector<2x64xf32> to vector<2x32xf32>
    %9 = vector.extract_strided_slice %7 {offsets = [0, 32], sizes = [2, 32], strides = [1, 1]} : vector<2x64xf32> to vector<2x32xf32>
    %c0_6 = arith.constant 0 : index
    %c0_7 = arith.constant 0 : index
    %10 = vector.load %arg4[%c0_6, %c0_7] : memref<32x32xf32, #tpu.memory_space<vmem>>, vector<32x32xf32>
    %cst_8 = arith.constant dense<0.000000e+00> : vector<2x32xf32>
    %11 = tpu.matmul %8, %10, %cst_8 {dimension_numbers = #tpu.dot_dimension_numbers<[1], [0], [0], [1], [0, 0, 1, 1], [], []>} : vector<2x32xf32>, vector<32x32xf32>, vector<2x32xf32> -> vector<2x32xf32>
    %c0_9 = arith.constant 0 : index
    %c0_10 = arith.constant 0 : index
    %12 = vector.load %arg5[%c0_9, %c0_10] : memref<1x32xf32, #tpu.memory_space<vmem>>, vector<1x32xf32>
    %13 = vector.broadcast %12 : vector<1x32xf32> to vector<2x32xf32>
    %14 = arith.addf %11, %13 : vector<2x32xf32>
    %cst_11 = arith.constant 0.000000e+00 : f32
    %15 = vector.broadcast %cst_11 : f32 to vector<2x32xf32>
    %16 = arith.maximumf %14, %15 : vector<2x32xf32>
    %c0_12 = arith.constant 0 : index
    %c0_13 = arith.constant 0 : index
    %17 = vector.load %arg6[%c0_12, %c0_13] : memref<32x32xf32, #tpu.memory_space<vmem>>, vector<32x32xf32>
    %cst_14 = arith.constant dense<0.000000e+00> : vector<2x32xf32>
    %18 = tpu.matmul %9, %17, %cst_14 {dimension_numbers = #tpu.dot_dimension_numbers<[1], [0], [0], [1], [0, 0, 1, 1], [], []>} : vector<2x32xf32>, vector<32x32xf32>, vector<2x32xf32> -> vector<2x32xf32>
    %c0_15 = arith.constant 0 : index
    %c0_16 = arith.constant 0 : index
    %19 = vector.load %arg7[%c0_15, %c0_16] : memref<1x32xf32, #tpu.memory_space<vmem>>, vector<1x32xf32>
    %20 = vector.broadcast %19 : vector<1x32xf32> to vector<2x32xf32>
    %21 = arith.addf %18, %20 : vector<2x32xf32>
    %cst_17 = arith.constant 0.000000e+00 : f32
    %22 = vector.broadcast %cst_17 : f32 to vector<2x32xf32>
    %23 = arith.maximumf %21, %22 : vector<2x32xf32>
    %c0_18 = arith.constant 0 : index
    %c0_19 = arith.constant 0 : index
    %24 = vector.load %arg8[%c0_18, %c0_19] : memref<32x128xf32, #tpu.memory_space<vmem>>, vector<32x128xf32>
    %cst_20 = arith.constant dense<0.000000e+00> : vector<2x128xf32>
    %25 = tpu.matmul %16, %24, %cst_20 {dimension_numbers = #tpu.dot_dimension_numbers<[1], [0], [0], [1], [0, 0, 1, 1], [], []>} : vector<2x32xf32>, vector<32x128xf32>, vector<2x128xf32> -> vector<2x128xf32>
    %c0_21 = arith.constant 0 : index
    %c0_22 = arith.constant 0 : index
    %26 = vector.load %arg9[%c0_21, %c0_22] : memref<32x128xf32, #tpu.memory_space<vmem>>, vector<32x128xf32>
    %cst_23 = arith.constant dense<0.000000e+00> : vector<2x128xf32>
    %27 = tpu.matmul %23, %26, %cst_23 {dimension_numbers = #tpu.dot_dimension_numbers<[1], [0], [0], [1], [0, 0, 1, 1], [], []>} : vector<2x32xf32>, vector<32x128xf32>, vector<2x128xf32> -> vector<2x128xf32>
    %28 = arith.addf %25, %27 : vector<2x128xf32>
    %c0_24 = arith.constant 0 : index
    %c0_25 = arith.constant 0 : index
    %29 = vector.load %arg10[%c0_24, %c0_25] : memref<1x128xf32, #tpu.memory_space<vmem>>, vector<1x128xf32>
    %30 = vector.broadcast %29 : vector<1x128xf32> to vector<2x128xf32>
    %31 = arith.addf %28, %30 : vector<2x128xf32>
    %32 = tpu.iota {dimensions = array<i32: 1>} : vector<2x128xi32>
    %33 = math.tanh %31 : vector<2x128xf32>
    %cst_26 = arith.constant 0.000000e+00 : f32
    %34 = vector.broadcast %cst_26 : f32 to vector<2x128xf32>
    %35 = arith.maximumf %31, %34 : vector<2x128xf32>
    %36 = math.absf %31 : vector<2x128xf32>
    %cst_27 = arith.constant 0.000000e+00 : f32
    %37 = vector.broadcast %cst_27 : f32 to vector<2x128xf32>
    %38 = arith.subf %37, %36 : vector<2x128xf32>
    %39 = math.exp %38 : vector<2x128xf32>
    %40 = math.log1p %39 : vector<2x128xf32>
    %41 = arith.addf %35, %40 : vector<2x128xf32>
    %cst_28 = arith.constant 9.99999997E-7 : f32
    %42 = vector.broadcast %cst_28 : f32 to vector<2x128xf32>
    %43 = arith.addf %41, %42 : vector<2x128xf32>
    %c4_i32 = arith.constant 4 : i32
    %44 = vector.broadcast %c4_i32 : i32 to vector<2x128xi32>
    %45 = arith.cmpi slt, %32, %44 : vector<2x128xi32>
    %c8_i32 = arith.constant 8 : i32
    %46 = vector.broadcast %c8_i32 : i32 to vector<2x128xi32>
    %47 = arith.cmpi slt, %32, %46 : vector<2x128xi32>
    %48 = arith.select %47, %43, %31 : vector<2x128xi1>, vector<2x128xf32>
    %49 = arith.select %45, %33, %48 : vector<2x128xi1>, vector<2x128xf32>
    %c0_29 = arith.constant 0 : index
    %c0_30 = arith.constant 0 : index
    %50 = vector.load %arg11[%c0_29, %c0_30] : memref<2x128xf32, #tpu.memory_space<vmem>>, vector<2x128xf32>
    tpu.vector_store %arg11[%c0_29, %c0_30], %49 {strides = array<i32>} : memref<2x128xf32, #tpu.memory_space<vmem>>, vector<2x128xf32>,
    return
  }
  func.func @transform_0(%arg0: i32) -> (i32, i32) {
    %c0_i32 = arith.constant 0 : i32
    %c0_i32_0 = arith.constant 0 : i32
    return %arg0, %c0_i32 : i32, i32
  }
  func.func @transform_1(%arg0: i32) -> (i32, i32) {
    %c0_i32 = arith.constant 0 : i32
    %c0_i32_0 = arith.constant 0 : i32
    %c0_i32_1 = arith.constant 0 : i32
    return %c0_i32, %c0_i32_0 : i32, i32
  }
  func.func @transform_2(%arg0: i32) -> (i32, i32) {
    %c0_i32 = arith.constant 0 : i32
    %c0_i32_0 = arith.constant 0 : i32
    %c0_i32_1 = arith.constant 0 : i32
    return %c0_i32, %c0_i32_0 : i32, i32
  }
  func.func @transform_3(%arg0: i32) -> (i32, i32) {
    %c0_i32 = arith.constant 0 : i32
    %c0_i32_0 = arith.constant 0 : i32
    %c0_i32_1 = arith.constant 0 : i32
    return %c0_i32, %c0_i32_0 : i32, i32
  }
  func.func @transform_4(%arg0: i32) -> (i32, i32) {
    %c0_i32 = arith.constant 0 : i32
    %c0_i32_0 = arith.constant 0 : i32
    %c0_i32_1 = arith.constant 0 : i32
    return %c0_i32, %c0_i32_0 : i32, i32
  }
  func.func @transform_5(%arg0: i32) -> (i32, i32) {
    %c0_i32 = arith.constant 0 : i32
    %c0_i32_0 = arith.constant 0 : i32
    %c0_i32_1 = arith.constant 0 : i32
    return %c0_i32, %c0_i32_0 : i32, i32
  }
  func.func @transform_6(%arg0: i32) -> (i32, i32) {
    %c0_i32 = arith.constant 0 : i32
    %c0_i32_0 = arith.constant 0 : i32
    %c0_i32_1 = arith.constant 0 : i32
    return %c0_i32, %c0_i32_0 : i32, i32
  }
  func.func @transform_7(%arg0: i32) -> (i32, i32) {
    %c0_i32 = arith.constant 0 : i32
    %c0_i32_0 = arith.constant 0 : i32
    %c0_i32_1 = arith.constant 0 : i32
    return %c0_i32, %c0_i32_0 : i32, i32
  }
  func.func @transform_8(%arg0: i32) -> (i32, i32) {
    %c0_i32 = arith.constant 0 : i32
    %c0_i32_0 = arith.constant 0 : i32
    %c0_i32_1 = arith.constant 0 : i32
    return %c0_i32, %c0_i32_0 : i32, i32
  }
  func.func @transform_9(%arg0: i32) -> (i32, i32) {
    %c0_i32 = arith.constant 0 : i32
    %c0_i32_0 = arith.constant 0 : i32
    %c0_i32_1 = arith.constant 0 : i32
    return %c0_i32, %c0_i32_0 : i32, i32
  }
  func.func @transform_10(%arg0: i32) -> (i32, i32) {
    %c0_i32 = arith.constant 0 : i32
    %c0_i32_0 = arith.constant 0 : i32
    return %arg0, %c0_i32 : i32, i32
  }
}

</mosaic_0001>

<bundles_post_ra>
// kernel: actor_critic_forward.1
= control target key start
LH: loop header
LB: loop body
LE: loop exit
PB: predicated region body
PF: predicated region fallthrough
CT: control target
= control target key end

     0   :  { %15 = vsyncpa [#allocation3], 0  ;;  %s940_s0 = inlined_call_operand.hbm [shape: f32[2,16], index: 0, kind: input, shape index: {}]   ;;  %s941_s1 = inlined_call_operand.hbm [shape: f32[16,64], index: 1, kind: input, shape index: {}]   ;;  %s942_s2 = inlined_call_operand.vmem [shape: f32[1,64], index: 2, kind: input, shape index: {}]   ;;  %s943_s3 = inlined_call_operand.hbm [shape: f32[32,32], index: 3, kind: input, shape index: {}]   ;;  %s944_s4 = inlined_call_operand.vmem [shape: f32[1,32], index: 4, kind: input, shape index: {}]   ;;  %s945_s5 = inlined_call_operand.hbm [shape: f32[32,32], index: 5, kind: input, shape index: {}]   ;;  %s946_s6 = inlined_call_operand.vmem [shape: f32[1,32], index: 6, kind: input, shape index: {}]   ;;  %s947_s7 = inlined_call_operand.hbm [shape: f32[32,128], index: 7, kind: input, shape index: {}]   ;;  %s948_s8 = inlined_call_operand.hbm [shape: f32[32,128], index: 8, kind: input, shape index: {}]   ;;  %s949_s9 = inlined_call_operand.vmem [shape: f32[1,128], index: 9, kind: input, shape index: {}]   ;;  %s950_s10 = inlined_call_operand.vmem [shape: f32[2,128], index: 10, kind: output, shape index: {}]  }
   0x1   :  { %16 = vsyncpa [#allocation5], 0 }
   0x2   :  { %17 = vsyncpa [#allocation8], 0 }
   0x3   :  { %18 = vsyncpa [#allocation11], 0  ;;  %s794_s13 = smov [#allocation4]  }
   0x4   :  { %s34_s14 = sshll.u32 %s794_s13, 4  ;;  %s35_s14 = int_to_ptr.vmem [resolvable:$true] %s34_s14 }
   0x5   :  { %s674_s15 = scalar_lea.vmem %s35_s14, 256  ;;  %p679_p1 = scmp.lt.s32.totalorder %s35_s14, %s35_s14 }
   0x6   :  { %p675_p0 = scmp.ne.s32.totalorder %s35_s14, %s674_s15  ;;  %p680_p2 = scmp.lt.s32.totalorder %s674_s15, %s674_s15 }
   0x8   :  { %p681_p3 = por %p680_p2, %p679_p1 }
   0xa   :  { %p682_p4 = pnand %p681_p3, %p675_p0 }
   0xc   :  { %685 = shalt.err (!%p682_p4)
}
   0xd   :  { %s795_s16 = smov 128   ;;  %s796_s17 = smov 8  }
   0xe   :  { %40 = dma.hbm_to_vmem [thread:$0]  %s941_s1, 256, %s35_s14, [#allocation5], %s795_s16, %s795_s16, %s796_s17  }
   0xf   :  { %s797_s20 = smov [#allocation7]   ;;  %s798_s22 = smov [#allocation2]  }
  0x10   :  { %s62_s21 = sshll.u32 %s797_s20, 4  ;;  %s25_s23 = sshll.u32 %s798_s22, 4  ;;  %s63_s21 = int_to_ptr.vmem [resolvable:$true] %s62_s21  ;;  %s26_s23 = int_to_ptr.vmem [resolvable:$true] %s25_s23 }
  0x11   :  { %s694_s24 = scalar_lea.vmem %s63_s21, 512  ;;  %p699_p6 = scmp.lt.s32.totalorder %s63_s21, %s63_s21 }
  0x12   :  { %p695_p5 = scmp.ne.s32.totalorder %s63_s21, %s694_s24  ;;  %p700_p7 = scmp.lt.s32.totalorder %s694_s24, %s694_s24 }
  0x14   :  { %p701_p8 = por %p700_p7, %p699_p6 }
  0x16   :  { %p702_p9 = pnand %p701_p8, %p695_p5 }
  0x18   :  { %705 = shalt.err (!%p702_p9)
}
  0x19   :  { %68 = dma.hbm_to_vmem [thread:$0]  %s945_s5, 512, %s63_s21, [#allocation8], %s795_s16, %s795_s16, %s796_s17  }
  0x1a   :  { %s714_s1 = scalar_lea.vmem %s26_s23, 32  ;;  %p719_p11 = scmp.lt.s32.totalorder %s26_s23, %s26_s23 }
  0x1b   :  { %p715_p10 = scmp.ne.s32.totalorder %s26_s23, %s714_s1  ;;  %p720_p12 = scmp.lt.s32.totalorder %s714_s1, %s714_s1 }
  0x1d   :  { %p721_p13 = por %p720_p12, %p719_p11 }
  0x1f   :  { %p722_p0 = pnand %p721_p13, %p715_p10 }
  0x21   :  { %725 = shalt.err (!%p722_p0)
}
  0x22   :  { %28 = dma.hbm_to_vmem [thread:$0]  %s940_s0, 32, %s26_s23, [#allocation3]  }
  0x23   :  { %s799_s29 = smov [#allocation6]   ;;  %s800_s11 = smov [#allocation9]  }
  0x24   :  { %s48_s30 = sshll.u32 %s799_s29, 4  ;;  %s76_s12 = sshll.u32 %s800_s11, 4  ;;  %s49_s30 = int_to_ptr.vmem [resolvable:$true] %s48_s30  ;;  %s77_s12 = int_to_ptr.vmem [resolvable:$true] %s76_s12 }
  0x25   :  { %s734_s13 = scalar_lea.vmem %s49_s30, 512  ;;  %p739_p2 = scmp.lt.s32.totalorder %s49_s30, %s49_s30 }
  0x26   :  { %p735_p1 = scmp.ne.s32.totalorder %s49_s30, %s734_s13  ;;  %p740_p3 = scmp.lt.s32.totalorder %s734_s13, %s734_s13 }
  0x28   :  { %p741_p4 = por %p740_p3, %p739_p2 }
  0x2a   :  { %p742_p5 = pnand %p741_p4, %p735_p1 }
  0x2c   :  { %745 = shalt.err (!%p742_p5)
}
  0x2d   :  { %54 = dma.hbm_to_vmem [thread:$0]  %s943_s3, 512, %s49_s30, [#allocation5], %s795_s16, %s795_s16, %s796_s17  }
  0x2e   :  { %s754_s0 = scalar_lea.vmem %s77_s12, 512  ;;  %p759_p7 = scmp.lt.s32.totalorder %s77_s12, %s77_s12 }
  0x2f   :  { %p755_p6 = scmp.ne.s32.totalorder %s77_s12, %s754_s0  ;;  %p760_p8 = scmp.lt.s32.totalorder %s754_s0, %s754_s0 }
  0x31   :  { %p761_p9 = por %p760_p8, %p759_p7 }
  0x33   :  { %p762_p10 = pnand %p761_p9, %p755_p6 }
  0x35   :  { %765 = shalt.err (!%p762_p10)
}
  0x36   :  { %82 = dma.hbm_to_vmem [thread:$0]  %s947_s7, 512, %s77_s12, [#allocation8], %s795_s16, %s795_s16, %s796_s17  }
  0x37   :  { %s801_s19 = smov [#allocation10]  }
  0x38   :  { %s88_s20 = sshll.u32 %s801_s19, 4  ;;  %s89_s20 = int_to_ptr.vmem [resolvable:$true] %s88_s20 }
  0x39   :  { %s774_s21 = scalar_lea.vmem %s89_s20, 512  ;;  %p779_p12 = scmp.lt.s32.totalorder %s89_s20, %s89_s20 }
  0x3a   :  { %p775_p11 = scmp.ne.s32.totalorder %s89_s20, %s774_s21  ;;  %p780_p13 = scmp.lt.s32.totalorder %s774_s21, %s774_s21 }
  0x3c   :  { %p781_p0 = por %p780_p13, %p779_p12 }
  0x3e   :  { %p782_p1 = pnand %p781_p0, %p775_p11 }
  0x40   :  { %785 = shalt.err (!%p782_p1)
}
  0x41   :  { %94 = dma.hbm_to_vmem [thread:$0]  %s948_s8, 512, %s89_s20, [#allocation11], %s795_s16, %s795_s16, %s796_s17  }
  0x42   :  { %786 = dma.done.wait [#allocation3], 32  }
  0x43   :  { %787 = vsyncadd [#allocation3], 4294967264 }
  0x44   :  { %788 = dma.done.wait [#allocation5], 768  }
  0x45   :  { %789 = vsyncadd [#allocation5], 4294966528 }
  0x46   :  { %790 = dma.done.wait [#allocation8], 1024  }
  0x47   :  { %791 = vsyncadd [#allocation8], 4294966272 }
  0x48   :  { %792 = dma.done.wait [#allocation11], 512  }
  0x49   :  { %793 = vsyncadd [#allocation11], 4294966784  ;;  %v802_v0 = vmov 0.0   ;;  %vm803_vm0 = vmmov 0   ;;  %v117_v1 = vld [vmem:[#allocation4 + $0x8] sm:$0xff]  ;;  %v116_v2 = vld [vmem:[#allocation4] sm:$0xff]  ;;  %v534_v49 = vlaneseq }
  0x4a   :  { %598 = vmatprep.subr.mxu0 %v802_v0  ;;  %602 = vmatprep.mubr.msk.f32.mxu0 %vm803_vm0, %v802_v0  ;;  %v115_v3 = vld [vmem:[#allocation2] sm:$0x3]  ;;  %vm125_vm1 = vcmask 130048   ;;  %v203_v4 = vld [vmem:[#allocation6 + $0x18] sm:$0xff]  ;;  %v202_v5 = vld [vmem:[#allocation6 + $0x10] sm:$0xff]  ;;  %vm211_vm2 = vcmask 261120  }
  0x4b   :  { %605 = vmatprep.subr.mxu1 %v802_v0  ;;  %613 = vmatprep.mubr.msk.f32.mxu1 %vm803_vm0, %v802_v0  ;;  %v201_v6 = vld [vmem:[#allocation6 + $0x8] sm:$0xff]  ;;  %v200_v7 = vld [vmem:[#allocation6] sm:$0xff]  ;;  %v289_v8 = vld [vmem:[#allocation7 + $0x18] sm:$0xff]  ;;  %s804_s16 = smov 96   ;;  %v535_v53 = vand.u32 127, %v534_v49 }
  0x4c   :  { %599 = vmatpush3.msra.mxu0 %v117_v1  ;;  %606 = vmatpush3.msra.mxu1 %v203_v4  ;;  %v288_v9 = vld [vmem:[#allocation7 + $0x10] sm:$0xff]  ;;  %v287_v10 = vld [vmem:[#allocation7 + $0x8] sm:$0xff]  ;;  %v286_v11 = vld [vmem:[#allocation7] sm:$0xff] }
  0x4d   :  { %600 = vmatprep.subr.mxu0 %v802_v0  ;;  %607 = vmatprep.subr.mxu1 %v802_v0  ;;  %v566_v12 = vld [vmem:[%s942_s2] ss:$0 sm:$0xff]  ;;  %v379_v17 = vld [vmem:[#allocation10 + $0x18] sm:$0xff]  ;;  %v374_v20 = vld [vmem:[#allocation9 + $0x10] sm:$0xff]  ;;  %vm554_vm4 = vcmp.lt.s32.totalorder %v535_v53, 8  ;;  %vm553_vm5 = vcmp.lt.s32.totalorder %v535_v53, 4 }
  0x4e   :  { %601 = vmatpush3.msra.mxu0 %v116_v2  ;;  %608 = vmatpush3.msra.mxu1 %v202_v5  ;;  %v375_v18 = vld [vmem:[#allocation9 + $0x18] sm:$0xff]  ;;  %v373_v21 = vld [vmem:[#allocation9 + $0x8] sm:$0xff]  ;;  %v372_v22 = vld [vmem:[#allocation9] sm:$0xff] }
  0x4f   :  { %603 = vmatmul.mubr.msk.f32.vlgmr.msra.gmra.mxu0 %vm125_vm1, %v115_v3  ;;  %616 = vmatprep.subr.mxu0 %v802_v0  ;;  %v378_v23 = vld [vmem:[#allocation10 + $0x10] sm:$0xff]  ;;  %v377_v24 = vld [vmem:[#allocation10 + $0x8] sm:$0xff]  ;;  %v376_v25 = vld [vmem:[#allocation10] sm:$0xff] }
  0x50   :  { %624 = vmatprep.mubr.msk.f32.mxu0 %vm803_vm0, %v802_v0  ;;  %609 = vmatprep.subr.mxu1 %v802_v0  ;;  %v568_v26 = vld [vmem:[%s944_s4] ss:$0 sm:$0xff] }
  0x51   :  { %610 = vmatpush3.msra.mxu1 %v201_v6  ;;  %617 = vmatpush3.msra.mxu0 %v289_v8  ;;  %v570_v31 = vld [vmem:[%s946_s6] ss:$0 sm:$0xff] }
  0x52   :  { %611 = vmatprep.subr.mxu1 %v802_v0  ;;  %618 = vmatprep.subr.mxu0 %v802_v0  ;;  %v574_v39 = vld [vmem:[%s949_s9] ss:$0 sm:$0xff] }
  0x53   :  { %612 = vmatpush3.msra.mxu1 %v200_v7  ;;  %619 = vmatpush3.msra.mxu0 %v288_v9 }
  0x54   :  { %627 = vmatprep.subr.mxu1 %v802_v0  ;;  %620 = vmatprep.subr.mxu0 %v802_v0 }
  0x55   :  { %621 = vmatpush3.msra.mxu0 %v287_v10 }
  0x56   :  { %622 = vmatprep.subr.mxu0 %v802_v0 }
  0x57   :  { %623 = vmatpush3.msra.mxu0 %v286_v11 }
  0x58   :  { %638 = vmatprep.subr.mxu0 %v802_v0 }
 0x10f   :  { %v195_v13 = vpop.f32.mrf.mxu0 }
 0x110   :  { %v196_v14 = vadd.f32 %v566_v12, %v195_v13 }
 0x111   :  { %v604_v15 = vpop.f32.mrf.mxu0 }
 0x112   :  { %v199_v16 = vmax.f32 %v196_v14, 0.0 }
 0x114   :  { %614 = vmatmul.mubr.msk.f32.vlgmr.msra.gmra.mxu1 %vm211_vm2, %v199_v16  ;;  %297 = vrot.lane.b32.xlu0 %v199_v16, %s804_s16 }
 0x115   :  { %635 = vmatprep.mubr.msk.f32.mxu1 %vm803_vm0, %v802_v0  ;;  %628 = vmatpush3.msra.mxu1 %v379_v17 }
 0x116   :  { %629 = vmatprep.subr.mxu1 %v802_v0 }
 0x117   :  { %630 = vmatpush3.msra.mxu1 %v378_v23 }
 0x118   :  { %631 = vmatprep.subr.mxu1 %v802_v0 }
 0x119   :  { %632 = vmatpush3.msra.mxu1 %v377_v24 }
 0x11a   :  { %633 = vmatprep.subr.mxu1 %v802_v0 }
 0x11b   :  { %634 = vmatpush3.msra.mxu1 %v376_v25 }
 0x186   :  { %v298_v19 = vpop.permute.xlu0 %297 }
 0x187   :  { %625 = vmatmul.mubr.msk.f32.vlgmr.msra.gmra.mxu0 %vm211_vm2, %v298_v19 }
 0x188   :  { %639 = vmatpush3.msra.mxu0 %v375_v18  ;;  %646 = vmatprep.mubr.msk.f32.mxu0 %vm803_vm0, %v802_v0 }
 0x189   :  { %640 = vmatprep.subr.mxu0 %v802_v0 }
 0x18a   :  { %641 = vmatpush3.msra.mxu0 %v374_v20 }
 0x18b   :  { %642 = vmatprep.subr.mxu0 %v802_v0 }
 0x18c   :  { %643 = vmatpush3.msra.mxu0 %v373_v21 }
 0x18d   :  { %644 = vmatprep.subr.mxu0 %v802_v0 }
 0x18e   :  { %645 = vmatpush3.msra.mxu0 %v372_v22 }
 0x1d4   :  { %v281_v27 = vpop.f32.mrf.mxu1 }
 0x1d5   :  { %v282_v28 = vadd.f32 %v568_v26, %v281_v27 }
 0x1d6   :  { %v615_v29 = vpop.f32.mrf.mxu1 }
 0x1d7   :  { %v285_v30 = vmax.f32 %v282_v28, 0.0 }
 0x1d9   :  { %647 = vmatmul.mubr.msk.f32.vlgmr.msra.gmra.mxu0 %vm211_vm2, %v285_v30 }
 0x247   :  { %v367_v32 = vpop.f32.mrf.mxu0 }
 0x248   :  { %v368_v33 = vadd.f32 %v570_v31, %v367_v32 }
 0x249   :  { %v626_v34 = vpop.f32.mrf.mxu0 }
 0x24a   :  { %v371_v35 = vmax.f32 %v368_v33, 0.0 }
 0x24c   :  { %636 = vmatmul.mubr.msk.f32.vlgmr.msra.gmra.mxu1 %vm211_vm2, %v371_v35 }
 0x299   :  { %v522_v36 = vpop.f32.mrf.mxu0 }
 0x29b   :  { %v648_v37 = vpop.f32.mrf.mxu0 }
 0x30c   :  { %v449_v38 = vpop.f32.mrf.mxu1 }
 0x30d   :  { %v523_v40 = vadd.f32 %v522_v36, %v449_v38 }
 0x30e   :  { %v637_v41 = vpop.f32.mrf.mxu1 }
 0x30f   :  { %v533_v42 = vadd.f32 %v574_v39, %v523_v40 }
 0x311   :  { %v538_v43 = vand.u32 2147483647, %v533_v42  ;;  %v537_v56 = vmax.f32 %v533_v42, 0.0 }
 0x313   :  { %v539_v44 = vsub.f32 0.0, %v538_v43 }
 0x315   :  { %v540_v45 = vmul.f32 1.442695, %v539_v44 }
 0x317   :  { %660 = vpow2.f32 %v540_v45 }
 0x324   :  { %v661_v46 = vpop.eup %660 }
 0x325   :  { %v542_v47 = vadd.f32 1.0, %v661_v46  ;;  %v545_v48 = vmul.f32 -0.5, %v661_v46  ;;  %v548_v51 = vand.u32 2147483647, %v661_v46 }
 0x327   :  { %662 = vlog2.f32 %v542_v47  ;;  %v546_v50 = vadd.f32 1.0, %v545_v48  ;;  %vm549_vm3 = vcmp.lt.f32.partialorder %v548_v51, 0.0004427343 }
 0x328   :  { %664 = vtanh.f32 %v533_v42 }
 0x329   :  { %v547_v55 = vmul.f32 %v661_v46, %v546_v50 }
 0x334   :  { %v663_v52 = vpop.eup %662 }
 0x335   :  { %v544_v54 = vmul.f32 0.6931472, %v663_v52  ;;  %v665_v60 = vpop.eup %664 }
 0x337   :  { %v550_v57 = vsel %vm549_vm3, %v547_v55, %v544_v54 }
 0x338   :  { %v551_v58 = vadd.f32 %v550_v57, %v537_v56 }
 0x33a   :  { %v552_v59 = vadd.f32 1e-06, %v551_v58 }
 0x33c   :  { %v555_v61 = vsel %vm554_vm4, %v552_v59, %v533_v42 }
 0x33d   :  { %v556_v62 = vsel %vm553_vm5, %v665_v60, %v555_v61 }
 0x33e   :  { %557 = vst [vmem:[%s950_s10] sm:$0x3] %v556_v62 }
 0x33f   :  { %562 = vsyncpa [#allocation3], 1 }
 0x340   :  { %563 = vsyncpa [#allocation5], 1 }
 0x341   :  { %564 = vsyncpa [#allocation8], 1 }
 0x342   :  { %565 = vsyncpa [#allocation11], 1 }

</bundles_post_ra>
